<compile_context>
chip_gen: v6e
topology: v6e:2x2x1
jax: 0.10.0
libtpu: 0.0.40
codegen_flags: <defaults>
</compile_context>

<pallas_src>
import functools

import jax
import jax.numpy as jnp
from jax.experimental import pallas as pl
from jax.experimental.pallas import tpu as pltpu


def _basic_block_kernel(x_ref, t1_ref, b1_ref, t2_ref, b2_ref, sdn_ref, sup_ref,
                        o_ref, *, H, WC, pack):
    """Fused BasicBlock forward for a single batch element.

    x_ref  : (1, H, WC)    flattened rows of the (unpadded) NHWC input
    t*_ref : (3, WC, WC)   banded block-Toeplitz conv weights (one slab per ky)
    b*_ref : (1, WC)       per-row bias (bias tiled W times), float32
    s*_ref : (H, H)        vertical shift matrices (sub/super-diagonal identity)
    o_ref  : (1, H, WC) or (1, H//2, 2*WC) output block (lane-dense when packed)
    """
    x = x_ref[0]                     # (H, WC), loaded once in native dtype
    s_dn = sdn_ref[...]              # (S_dn @ a)[y] = a[y-1], zero row at y=0
    s_up = sup_ref[...]              # (S_up @ a)[y] = a[y+1], zero row at y=H-1

    def conv3x3(v, t_ref, b_row):
        # 3 fat MXU dots (K = N = W*C) instead of 9 tiny K=N=C taps; vertical
        # boundary handled by 2 tiny MXU dots with constant shift matrices.
        a0 = jnp.dot(v, t_ref[0], preferred_element_type=jnp.float32)
        a1 = jnp.dot(v, t_ref[1], preferred_element_type=jnp.float32)
        a2 = jnp.dot(v, t_ref[2], preferred_element_type=jnp.float32)
        acc = a1 + jnp.dot(s_dn, a0, preferred_element_type=jnp.float32)
        acc = acc + jnp.dot(s_up, a2, preferred_element_type=jnp.float32)
        return acc + b_row

    # conv1 + bias + ReLU (intermediate stays in vregs; no scratch round-trip).
    h1 = jnp.maximum(conv3x3(x, t1_ref, b1_ref[...]), 0.0)
    h1 = h1.astype(t2_ref.dtype)     # single cast before feeding the MXU again

    # conv2 + bias + residual (identity is just the loaded input slab).
    out = conv3x3(h1, t2_ref, b2_ref[...]) + x.astype(jnp.float32)
    out = out.astype(o_ref.dtype)    # (H, WC)

    if pack:
        # Lane-dense output block: top / bottom image halves side by side so the
        # out_spec's last dim is a multiple of 128 (aligned sublane slices only).
        half = H // 2
        o_ref[0, :, 0:WC] = out[:half]
        o_ref[0, :, WC:2 * WC] = out[half:]
    else:
        o_ref[0] = out


def _band_toeplitz(w_oihw, W):
    """OIHW (Cout, Cin, 3, 3) conv weight -> (3, W*Cin, W*Cout) banded Toeplitz.

    T[ky, wi*Cin + ci, wo*Cout + co] = w[co, ci, ky, wi - wo + 1] (0 outside the band),
    so conv_row(y) = sum_ky x_row(y + ky - 1) @ T[ky] with rows flattened to (W*C,).
    Horizontal zero-padding is encoded by the zero band edges.
    """
    Cout, Cin, KH, KW = w_oihw.shape
    w_hwio = jnp.transpose(w_oihw, (2, 3, 1, 0))              # (3, 3, Cin, Cout)
    wi = jnp.arange(W)[:, None]
    wo = jnp.arange(W)[None, :]
    dx = wi - wo + 1                                          # (W, W)
    mask = (dx >= 0) & (dx < KW)
    kx = jnp.clip(dx, 0, KW - 1)
    t = w_hwio[:, kx]                                         # (3, W, W, Cin, Cout)
    t = t * mask[None, :, :, None, None].astype(w_hwio.dtype)
    t = jnp.transpose(t, (0, 1, 3, 2, 4))                     # (3, W, Cin, W, Cout)
    return t.reshape(KH, W * Cin, W * Cout)


def basic_block_forward(x_nchw, w1_oihw, b1, w2_oihw, b2):
    """BasicBlock forward. x_nchw: (N, C, H, W) like PyTorch; returns (N, C, H, W)."""
    N, C, H, W = x_nchw.shape
    WC = W * C

    # NCHW -> (N, H, W*C): each row flattened to the lane axis. No spatial padding.
    x2d = jnp.transpose(x_nchw, (0, 2, 3, 1)).reshape(N, H, WC)

    # Weight-side preprocessing (done once per call; cacheable by the caller).
    t1 = _band_toeplitz(w1_oihw, W)                           # (3, WC, WC)
    t2 = _band_toeplitz(w2_oihw, W)
    b1_row = jnp.tile(b1.astype(jnp.float32), W).reshape(1, WC)
    b2_row = jnp.tile(b2.astype(jnp.float32), W).reshape(1, WC)
    s_dn = jnp.eye(H, k=-1, dtype=jnp.float32)                # out[y] += in[y-1]
    s_up = jnp.eye(H, k=1, dtype=jnp.float32)                 # out[y] += in[y+1]

    # Lane-dense output layout: last dim a multiple of 128 whenever possible.
    if WC % 128 == 0:
        pack = False
        out_struct = jax.ShapeDtypeStruct((N, H, WC), x_nchw.dtype)
        out_block = (1, H, WC)
    elif H % 2 == 0 and (2 * WC) % 128 == 0:
        pack = True
        out_struct = jax.ShapeDtypeStruct((N, H // 2, 2 * WC), x_nchw.dtype)
        out_block = (1, H // 2, 2 * WC)
    else:
        pack = False
        out_struct = jax.ShapeDtypeStruct((N, H, WC), x_nchw.dtype)
        out_block = (1, H, WC)

    kernel = functools.partial(_basic_block_kernel, H=H, WC=WC, pack=pack)

    # Advisory cost estimate (logical conv flops; bytes for x, weights, out).
    flops = int(2 * (2 * N * H * W * C * 9 * C))
    bytes_accessed = int((x2d.size + t1.size + t2.size + N * H * WC) * 4)

    out = pl.pallas_call(
        kernel,
        out_shape=out_struct,
        grid_spec=pltpu.PrefetchScalarGridSpec(
            num_scalar_prefetch=0,
            grid=(N,),
            in_specs=[
                pl.BlockSpec((1, H, WC), lambda n: (n, 0, 0)),
                pl.BlockSpec((3, WC, WC), lambda n: (0, 0, 0)),
                pl.BlockSpec((1, WC), lambda n: (0, 0)),
                pl.BlockSpec((3, WC, WC), lambda n: (0, 0, 0)),
                pl.BlockSpec((1, WC), lambda n: (0, 0)),
                pl.BlockSpec((H, H), lambda n: (0, 0)),
                pl.BlockSpec((H, H), lambda n: (0, 0)),
            ],
            out_specs=pl.BlockSpec(out_block, lambda n: (n, 0, 0)),
        ),
        compiler_params=pltpu.CompilerParams(
            dimension_semantics=("parallel",),
            vmem_limit_bytes=32 * 1024 * 1024,
        ),
        cost_estimate=pl.CostEstimate(
            flops=flops, transcendentals=0, bytes_accessed=bytes_accessed),
    )(x2d, t1, b1_row, t2, b2_row, s_dn, s_up)

    if pack:  # undo the lane packing (pure layout plumbing)
        out = jnp.concatenate([out[:, :, :WC], out[:, :, WC:]], axis=1)  # (N, H, WC)
    out_nhwc = out.reshape(N, H, W, C)
    return jnp.transpose(out_nhwc, (0, 3, 1, 2))  # back to NCHW


def _reference_forward(x, w1, b1, w2, b2):
    """Pure-JAX reference matching the PyTorch BasicBlock (NCHW / OIHW)."""
    def conv(y, w, b):
        z = jax.lax.conv_general_dilated(
            y, w, window_strides=(1, 1), padding=((1, 1), (1, 1)),
            dimension_numbers=("NCHW", "OIHW", "NCHW"))
        return z + b[None, :, None, None]

    out = jax.nn.relu(conv(x, w1, b1))
    out = conv(out, w2, b2)
    return out + x


if __name__ == "__main__":
    key = jax.random.PRNGKey(0)
    k_x, k_w1, k_b1, k_w2, k_b2 = jax.random.split(key, 5)

    N, C, H, W = 2, 4, 16, 16  # small NCHW input consistent with BasicBlock(in_channels=4)
    x = jax.random.normal(k_x, (N, C, H, W), dtype=jnp.float32)

    # Deterministic synthetic parameters (PyTorch conv shapes: OIHW + per-channel bias).
    w1 = jax.random.normal(k_w1, (C, C, 3, 3), dtype=jnp.float32) * 0.1
    b1 = jax.random.normal(k_b1, (C,), dtype=jnp.float32) * 0.1
    w2 = jax.random.normal(k_w2, (C, C, 3, 3), dtype=jnp.float32) * 0.1
    b2 = jax.random.normal(k_b2, (C,), dtype=jnp.float32) * 0.1

    out = jax.block_until_ready(basic_block_forward(x, w1, b1, w2, b2))
    ref = jax.block_until_ready(_reference_forward(x, w1, b1, w2, b2))

    assert out.shape == (N, C, H, W), out.shape
    assert jnp.allclose(out, ref, atol=1e-4, rtol=1e-4), float(jnp.max(jnp.abs(out - ref)))

    print("KERNEL_OK")
</pallas_src>

<mosaic_0001>
module attributes {stable_mosaic.version = 11 : i64} {
  func.func @_basic_block_kernel(%arg0: i32, %arg1: memref<1x16x64xf32, #tpu.memory_space<vmem>>, %arg2: memref<3x64x64xf32, #tpu.memory_space<vmem>>, %arg3: memref<1x64xf32, #tpu.memory_space<vmem>>, %arg4: memref<3x64x64xf32, #tpu.memory_space<vmem>>, %arg5: memref<1x64xf32, #tpu.memory_space<vmem>>, %arg6: memref<16x16xf32, #tpu.memory_space<vmem>>, %arg7: memref<16x16xf32, #tpu.memory_space<vmem>>, %arg8: memref<1x8x128xf32, #tpu.memory_space<vmem>>) attributes {dimension_semantics = [#tpu.dimension_semantics<parallel>], iteration_bounds = array<i64: 2>, scalar_prefetch = 0 : i64, scratch_operands = 0 : i64, tpu.core_type = #tpu.core_type<tc>, window_params = [{transform_indices = @transform_0, window_bounds = array<i64: 1, 16, 64>}, {pipeline_mode = #tpu.pipeline_mode<synchronous>, transform_indices = @transform_1, window_bounds = array<i64: 3, 64, 64>}, {pipeline_mode = #tpu.pipeline_mode<synchronous>, transform_indices = @transform_2, window_bounds = array<i64: 1, 64>}, {pipeline_mode = #tpu.pipeline_mode<synchronous>, transform_indices = @transform_3, window_bounds = array<i64: 3, 64, 64>}, {pipeline_mode = #tpu.pipeline_mode<synchronous>, transform_indices = @transform_4, window_bounds = array<i64: 1, 64>}, {pipeline_mode = #tpu.pipeline_mode<synchronous>, transform_indices = @transform_5, window_bounds = array<i64: 16, 16>}, {pipeline_mode = #tpu.pipeline_mode<synchronous>, transform_indices = @transform_6, window_bounds = array<i64: 16, 16>}, {transform_indices = @transform_7, window_bounds = array<i64: 1, 8, 128>}]} {
    %c0 = arith.constant 0 : index
    %c0_0 = arith.constant 0 : index
    %c0_1 = arith.constant 0 : index
    %0 = vector.load %arg1[%c0, %c0_0, %c0_1] : memref<1x16x64xf32, #tpu.memory_space<vmem>>, vector<1x16x64xf32>
    %1 = vector.shape_cast %0 : vector<1x16x64xf32> to vector<16x64xf32>
    %c0_2 = arith.constant 0 : index
    %c0_3 = arith.constant 0 : index
    %2 = vector.load %arg6[%c0_2, %c0_3] : memref<16x16xf32, #tpu.memory_space<vmem>>, vector<16x16xf32>
    %c0_4 = arith.constant 0 : index
    %c0_5 = arith.constant 0 : index
    %3 = vector.load %arg7[%c0_4, %c0_5] : memref<16x16xf32, #tpu.memory_space<vmem>>, vector<16x16xf32>
    %c0_6 = arith.constant 0 : index
    %c0_7 = arith.constant 0 : index
    %4 = vector.load %arg3[%c0_6, %c0_7] : memref<1x64xf32, #tpu.memory_space<vmem>>, vector<1x64xf32>
    %c0_8 = arith.constant 0 : index
    %c0_9 = arith.constant 0 : index
    %c0_10 = arith.constant 0 : index
    %5 = vector.load %arg2[%c0_8, %c0_9, %c0_10] : memref<3x64x64xf32, #tpu.memory_space<vmem>>, vector<1x64x64xf32>
    %6 = vector.shape_cast %5 : vector<1x64x64xf32> to vector<64x64xf32>
    %cst = arith.constant dense<0.000000e+00> : vector<16x64xf32>
    %7 = tpu.matmul %1, %6, %cst {dimension_numbers = #tpu.dot_dimension_numbers<[1], [0], [0], [1], [0, 0, 1, 1], [], []>} : vector<16x64xf32>, vector<64x64xf32>, vector<16x64xf32> -> vector<16x64xf32>
    %c1 = arith.constant 1 : index
    %c0_11 = arith.constant 0 : index
    %c0_12 = arith.constant 0 : index
    %8 = vector.load %arg2[%c1, %c0_11, %c0_12] : memref<3x64x64xf32, #tpu.memory_space<vmem>>, vector<1x64x64xf32>
    %9 = vector.shape_cast %8 : vector<1x64x64xf32> to vector<64x64xf32>
    %cst_13 = arith.constant dense<0.000000e+00> : vector<16x64xf32>
    %10 = tpu.matmul %1, %9, %cst_13 {dimension_numbers = #tpu.dot_dimension_numbers<[1], [0], [0], [1], [0, 0, 1, 1], [], []>} : vector<16x64xf32>, vector<64x64xf32>, vector<16x64xf32> -> vector<16x64xf32>
    %c2 = arith.constant 2 : index
    %c0_14 = arith.constant 0 : index
    %c0_15 = arith.constant 0 : index
    %11 = vector.load %arg2[%c2, %c0_14, %c0_15] : memref<3x64x64xf32, #tpu.memory_space<vmem>>, vector<1x64x64xf32>
    %12 = vector.shape_cast %11 : vector<1x64x64xf32> to vector<64x64xf32>
    %cst_16 = arith.constant dense<0.000000e+00> : vector<16x64xf32>
    %13 = tpu.matmul %1, %12, %cst_16 {dimension_numbers = #tpu.dot_dimension_numbers<[1], [0], [0], [1], [0, 0, 1, 1], [], []>} : vector<16x64xf32>, vector<64x64xf32>, vector<16x64xf32> -> vector<16x64xf32>
    %cst_17 = arith.constant dense<0.000000e+00> : vector<16x64xf32>
    %14 = tpu.matmul %2, %7, %cst_17 {dimension_numbers = #tpu.dot_dimension_numbers<[1], [0], [0], [1], [0, 0, 1, 1], [], []>} : vector<16x16xf32>, vector<16x64xf32>, vector<16x64xf32> -> vector<16x64xf32>
    %15 = arith.addf %10, %14 : vector<16x64xf32>
    %cst_18 = arith.constant dense<0.000000e+00> : vector<16x64xf32>
    %16 = tpu.matmul %3, %13, %cst_18 {dimension_numbers = #tpu.dot_dimension_numbers<[1], [0], [0], [1], [0, 0, 1, 1], [], []>} : vector<16x16xf32>, vector<16x64xf32>, vector<16x64xf32> -> vector<16x64xf32>
    %17 = arith.addf %15, %16 : vector<16x64xf32>
    %18 = vector.broadcast %4 : vector<1x64xf32> to vector<16x64xf32>
    %19 = arith.addf %17, %18 : vector<16x64xf32>
    %cst_19 = arith.constant 0.000000e+00 : f32
    %20 = vector.broadcast %cst_19 : f32 to vector<16x64xf32>
    %21 = arith.maximumf %19, %20 : vector<16x64xf32>
    %c0_20 = arith.constant 0 : index
    %c0_21 = arith.constant 0 : index
    %22 = vector.load %arg5[%c0_20, %c0_21] : memref<1x64xf32, #tpu.memory_space<vmem>>, vector<1x64xf32>
    %c0_22 = arith.constant 0 : index
    %c0_23 = arith.constant 0 : index
    %c0_24 = arith.constant 0 : index
    %23 = vector.load %arg4[%c0_22, %c0_23, %c0_24] : memref<3x64x64xf32, #tpu.memory_space<vmem>>, vector<1x64x64xf32>
    %24 = vector.shape_cast %23 : vector<1x64x64xf32> to vector<64x64xf32>
    %cst_25 = arith.constant dense<0.000000e+00> : vector<16x64xf32>
    %25 = tpu.matmul %21, %24, %cst_25 {dimension_numbers = #tpu.dot_dimension_numbers<[1], [0], [0], [1], [0, 0, 1, 1], [], []>} : vector<16x64xf32>, vector<64x64xf32>, vector<16x64xf32> -> vector<16x64xf32>
    %c1_26 = arith.constant 1 : index
    %c0_27 = arith.constant 0 : index
    %c0_28 = arith.constant 0 : index
    %26 = vector.load %arg4[%c1_26, %c0_27, %c0_28] : memref<3x64x64xf32, #tpu.memory_space<vmem>>, vector<1x64x64xf32>
    %27 = vector.shape_cast %26 : vector<1x64x64xf32> to vector<64x64xf32>
    %cst_29 = arith.constant dense<0.000000e+00> : vector<16x64xf32>
    %28 = tpu.matmul %21, %27, %cst_29 {dimension_numbers = #tpu.dot_dimension_numbers<[1], [0], [0], [1], [0, 0, 1, 1], [], []>} : vector<16x64xf32>, vector<64x64xf32>, vector<16x64xf32> -> vector<16x64xf32>
    %c2_30 = arith.constant 2 : index
    %c0_31 = arith.constant 0 : index
    %c0_32 = arith.constant 0 : index
    %29 = vector.load %arg4[%c2_30, %c0_31, %c0_32] : memref<3x64x64xf32, #tpu.memory_space<vmem>>, vector<1x64x64xf32>
    %30 = vector.shape_cast %29 : vector<1x64x64xf32> to vector<64x64xf32>
    %cst_33 = arith.constant dense<0.000000e+00> : vector<16x64xf32>
    %31 = tpu.matmul %21, %30, %cst_33 {dimension_numbers = #tpu.dot_dimension_numbers<[1], [0], [0], [1], [0, 0, 1, 1], [], []>} : vector<16x64xf32>, vector<64x64xf32>, vector<16x64xf32> -> vector<16x64xf32>
    %cst_34 = arith.constant dense<0.000000e+00> : vector<16x64xf32>
    %32 = tpu.matmul %2, %25, %cst_34 {dimension_numbers = #tpu.dot_dimension_numbers<[1], [0], [0], [1], [0, 0, 1, 1], [], []>} : vector<16x16xf32>, vector<16x64xf32>, vector<16x64xf32> -> vector<16x64xf32>
    %33 = arith.addf %28, %32 : vector<16x64xf32>
    %cst_35 = arith.constant dense<0.000000e+00> : vector<16x64xf32>
    %34 = tpu.matmul %3, %31, %cst_35 {dimension_numbers = #tpu.dot_dimension_numbers<[1], [0], [0], [1], [0, 0, 1, 1], [], []>} : vector<16x16xf32>, vector<16x64xf32>, vector<16x64xf32> -> vector<16x64xf32>
    %35 = arith.addf %33, %34 : vector<16x64xf32>
    %36 = vector.broadcast %22 : vector<1x64xf32> to vector<16x64xf32>
    %37 = arith.addf %35, %36 : vector<16x64xf32>
    %38 = arith.addf %37, %1 : vector<16x64xf32>
    %39 = vector.extract_strided_slice %38 {offsets = [0, 0], sizes = [8, 64], strides = [1, 1]} : vector<16x64xf32> to vector<8x64xf32>
    %c0_36 = arith.constant 0 : index
    %c0_37 = arith.constant 0 : index
    %c0_38 = arith.constant 0 : index
    %40 = vector.load %arg8[%c0_36, %c0_37, %c0_38] : memref<1x8x128xf32, #tpu.memory_space<vmem>>, vector<1x8x64xf32>
    %41 = vector.shape_cast %40 : vector<1x8x64xf32> to vector<8x64xf32>
    %42 = vector.shape_cast %39 : vector<8x64xf32> to vector<1x8x64xf32>
    tpu.vector_store %arg8[%c0_36, %c0_37, %c0_38], %42 {strides = array<i32>} : memref<1x8x128xf32, #tpu.memory_space<vmem>>, vector<1x8x64xf32>,
    %43 = vector.extract_strided_slice %38 {offsets = [8, 0], sizes = [8, 64], strides = [1, 1]} : vector<16x64xf32> to vector<8x64xf32>
    %c0_39 = arith.constant 0 : index
    %c0_40 = arith.constant 0 : index
    %c64 = arith.constant 64 : index
    %44 = vector.load %arg8[%c0_39, %c0_40, %c64] : memref<1x8x128xf32, #tpu.memory_space<vmem>>, vector<1x8x64xf32>
    %45 = vector.shape_cast %44 : vector<1x8x64xf32> to vector<8x64xf32>
    %46 = vector.shape_cast %43 : vector<8x64xf32> to vector<1x8x64xf32>
    tpu.vector_store %arg8[%c0_39, %c0_40, %c64], %46 {strides = array<i32>} : memref<1x8x128xf32, #tpu.memory_space<vmem>>, vector<1x8x64xf32>,
    return
  }
  func.func @transform_0(%arg0: i32) -> (i32, i32, i32) {
    %c0_i32 = arith.constant 0 : i32
    %c0_i32_0 = arith.constant 0 : i32
    %c0_i32_1 = arith.constant 0 : i32
    return %arg0, %c0_i32, %c0_i32_0 : i32, i32, i32
  }
  func.func @transform_1(%arg0: i32) -> (i32, i32, i32) {
    %c0_i32 = arith.constant 0 : i32
    %c0_i32_0 = arith.constant 0 : i32
    %c0_i32_1 = arith.constant 0 : i32
    %c0_i32_2 = arith.constant 0 : i32
    return %c0_i32, %c0_i32_0, %c0_i32_1 : i32, i32, i32
  }
  func.func @transform_2(%arg0: i32) -> (i32, i32) {
    %c0_i32 = arith.constant 0 : i32
    %c0_i32_0 = arith.constant 0 : i32
    %c0_i32_1 = arith.constant 0 : i32
    return %c0_i32, %c0_i32_0 : i32, i32
  }
  func.func @transform_3(%arg0: i32) -> (i32, i32, i32) {
    %c0_i32 = arith.constant 0 : i32
    %c0_i32_0 = arith.constant 0 : i32
    %c0_i32_1 = arith.constant 0 : i32
    %c0_i32_2 = arith.constant 0 : i32
    return %c0_i32, %c0_i32_0, %c0_i32_1 : i32, i32, i32
  }
  func.func @transform_4(%arg0: i32) -> (i32, i32) {
    %c0_i32 = arith.constant 0 : i32
    %c0_i32_0 = arith.constant 0 : i32
    %c0_i32_1 = arith.constant 0 : i32
    return %c0_i32, %c0_i32_0 : i32, i32
  }
  func.func @transform_5(%arg0: i32) -> (i32, i32) {
    %c0_i32 = arith.constant 0 : i32
    %c0_i32_0 = arith.constant 0 : i32
    %c0_i32_1 = arith.constant 0 : i32
    return %c0_i32, %c0_i32_0 : i32, i32
  }
  func.func @transform_6(%arg0: i32) -> (i32, i32) {
    %c0_i32 = arith.constant 0 : i32
    %c0_i32_0 = arith.constant 0 : i32
    %c0_i32_1 = arith.constant 0 : i32
    return %c0_i32, %c0_i32_0 : i32, i32
  }
  func.func @transform_7(%arg0: i32) -> (i32, i32, i32) {
    %c0_i32 = arith.constant 0 : i32
    %c0_i32_0 = arith.constant 0 : i32
    %c0_i32_1 = arith.constant 0 : i32
    return %arg0, %c0_i32, %c0_i32_0 : i32, i32, i32
  }
}

</mosaic_0001>

<bundles_post_ra>
// kernel: tpu_custom_call.1
= control target key start
LH: loop header
LB: loop body
LE: loop exit
PB: predicated region body
PF: predicated region fallthrough
CT: control target
= control target key end

     0   :  { %s2226_s0 = inlined_call_operand.hbm [shape: f32[2,16,64], index: 0, kind: input, shape index: {}]   ;;  %s2227_s1 = inlined_call_operand.hbm [shape: f32[3,64,64], index: 1, kind: input, shape index: {}]   ;;  %s2228_s2 = inlined_call_operand.vmem [shape: f32[1,64], index: 2, kind: input, shape index: {}]   ;;  %s2229_s3 = inlined_call_operand.hbm [shape: f32[3,64,64], index: 3, kind: input, shape index: {}]   ;;  %s2230_s4 = inlined_call_operand.vmem [shape: f32[1,64], index: 4, kind: input, shape index: {}]   ;;  %s2231_s5 = inlined_call_operand.hbm [shape: f32[16,16], index: 5, kind: input, shape index: {}]   ;;  %s2232_s6 = inlined_call_operand.hbm [shape: f32[16,16], index: 6, kind: input, shape index: {}]   ;;  %s2233_s7 = inlined_call_operand.hbm [shape: f32[2,8,128], index: 7, kind: output, shape index: {}]  }
   0x1   :  { %2240 = sst [smem:[#allocation16_spill]] %s2227_s1 }
   0x2   :  { %12 = vsyncpa [#allocation3], 0 }
   0x3   :  { %14 = vsyncpa [#allocation3 + $0x1], 0 }
   0x4   :  { %15 = vsyncpa [#allocation6], 0 }
   0x5   :  { %16 = vsyncpa [#allocation9], 0 }
   0x6   :  { %17 = vsyncpa [#allocation4], 0 }
   0x7   :  { %19 = vsyncpa [#allocation4 + $0x1], 0  ;;  %s1951_s24 = smov 0   ;;  %s1953_s25 = smov 0  }
   0x8   :  { %s1955_s26 = smov 0   ;;  %s1957_s27 = smov 0  }
   0x9 LB: > { %s1972_s28 = sadd.s32 4294967295, %s1900_s27   ;;  %s1344_s29 = sadd.s32 4294967294, %s1900_s27   ;;  %s1900_s27 = sphi %s1957_s27, %s2262_s27   ;;  %s1896_s26 = sphi %s1955_s26, %s2261_s26   ;;  %s1892_s25 = sphi %s1953_s25, %s2260_s25   ;;  %s1888_s24 = sphi %s1951_s24, %s2259_s24  }
   0xa   : > { %p45_p0 = scmp.ne.s32.totalorder %s1892_s25, %s1888_s24  ;;  %p2234_p1 = scmp.eq.s32.totalorder %s1972_s28, 0 }
   0xb   : > { %p195_p2 = scmp.eq.s32.totalorder %s1972_s28, 1  ;;  %p201_p3 = scmp.eq.s32.totalorder %s1344_s29, 1 }
   0xc   : > { %p1981_p4 = por %p2234_p1, %p45_p0  ;;  %p1345_p5 = scmp.ge.s32.totalorder %s1900_s27, 1 }
   0xd   : > { %p1986_p6 = por %p201_p3, %p45_p0  ;;  %p208_p7 = scmp.lt.s32.totalorder %s1900_s27, 3 }
   0xe   : > { %s2241_s30 = scalar_select %p1981_p4, 1, 0 }
   0xf   : > { %s2242_s8 = scalar_select %p1986_p6, 1, 0 }
  0x10   : > { %p1991_p8 = pnand %p1345_p5, %p208_p7  ;;  %s1902_s10 = smov [#allocation5]  }
  0x11   : > { %s220_s11 = sshll.u32 %s1902_s10, 4  ;;  %s1903_s13 = smov [#allocation8]   ;;  %s221_s11 = int_to_ptr.vmem [resolvable:$true] %s220_s11 }
  0x12   : > { %s2243_s9 = scalar_select %p1991_p8, 1, 0 }
  0x13   : > { %p1626_p9 = pneg %p1991_p8  ;;  %s252_s14 = sshll.u32 %s1903_s13, 4  ;;  %s253_s14 = int_to_ptr.vmem [resolvable:$true] %s252_s14 }
  0x14   : > { %s1904_s15 = smov [#allocation7]   ;;  %s1707_s17 = scalar_lea.vmem %s221_s11, 3072 }
  0x15   : > { %p2000_p11 = pnand %p1626_p9, %p2234_p1  ;;  %s236_s16 = sshll.u32 %s1904_s15, 4  ;;  %s237_s16 = int_to_ptr.vmem [resolvable:$true] %s236_s16 }
  0x16   : > { %p1708_p13 = scmp.ne.s32.totalorder %s221_s11, %s1707_s17  ;;  %p1715_p5 = scmp.lt.s32.totalorder %s221_s11, %s221_s11 }
  0x17   : > { %p1698_p12 = pneg %p2000_p11  ;;  %p1716_p7 = scmp.lt.s32.totalorder %s1707_s17, %s1707_s17 }
  0x19   : > { %p1710_p0 = pnand %p1708_p13, %p1698_p12  ;;  %p1717_p9 = por %p1716_p7, %p1715_p5 }
  0x1b   : > { %p1711_p3 = pneg %p1710_p0 }
  0x1d   : > { %p1718_p10 = pnand %p1717_p9, %p1711_p3 }
  0x1f   : > { %1721 = shalt.err (!%p1718_p10)
}
  0x20   : > { %s2235_s18 = smov 128   ;;  %s2236_s19 = smov 8  }
  0x21   : > { %s2245_s1 = sld [smem:[#allocation16_spill]]  ;;  %s1733_s22 = scalar_lea.vmem %s253_s14, 256 }
  0x22   : > { %p1734_p13 = scmp.ne.s32.totalorder %s253_s14, %s1733_s22  ;;  %p1741_p3 = scmp.lt.s32.totalorder %s253_s14, %s253_s14 }
  0x23   : > { %p1742_p10 = scmp.lt.s32.totalorder %s1733_s22, %s1733_s22 }
  0x24   : > { %p1736_p0 = pnand %p1734_p13, %p1698_p12 }
  0x25   : > { %p1743_p7 = por %p1742_p10, %p1741_p3 }
  0x26   : > { %p1737_p5 = pneg %p1736_p0 }
  0x27   : > { %1629 = dma.hbm_to_vmem [thread:$0]  (!%p2000_p11), %s2245_s1, 3072, %s221_s11, [#allocation6], %s2235_s18, %s2235_s18, %s2236_s19  }
  0x28   : > { %p1744_p9 = pnand %p1743_p7, %p1737_p5 }
  0x2a   : > { %1747 = shalt.err (!%p1744_p9)
}
  0x2b   : > { %1635 = dma.hbm_to_vmem [thread:$0]  (!%p2000_p11), %s2231_s5, 256, %s253_s14, [#allocation9], %s2235_s18, %s2235_s18, %s2236_s19  }
  0x2c   : > { %s1759_s10 = scalar_lea.vmem %s237_s16, 3072  ;;  %p1767_p3 = scmp.lt.s32.totalorder %s237_s16, %s237_s16 }
  0x2d   : > { %p1760_p1 = scmp.ne.s32.totalorder %s237_s16, %s1759_s10  ;;  %p1768_p5 = scmp.lt.s32.totalorder %s1759_s10, %s1759_s10 }
  0x2f   : > { %p1762_p13 = pnand %p1760_p1, %p1698_p12  ;;  %p1769_p10 = por %p1768_p5, %p1767_p3 }
  0x31   : > { %p1763_p0 = pneg %p1762_p13 }
  0x33   : > { %p1770_p7 = pnand %p1769_p10, %p1763_p0 }
  0x35   : > { %1773 = shalt.err (!%p1770_p7)
}
  0x36   : > { %1632 = dma.hbm_to_vmem [thread:$0]  (!%p2000_p11), %s2229_s3, 3072, %s237_s16, [#allocation6], %s2235_s18, %s2235_s18, %s2236_s19  }
  0x37   : > { %s1907_s14 = smov [#allocation10]  }
  0x38   : > { %s265_s15 = sshll.u32 %s1907_s14, 4  ;;  %s266_s15 = int_to_ptr.vmem [resolvable:$true] %s265_s15 }
  0x39   : > { %s1785_s17 = scalar_lea.vmem %s266_s15, 256  ;;  %p1793_p0 = scmp.lt.s32.totalorder %s266_s15, %s266_s15 }
  0x3a   : > { %p1786_p1 = scmp.ne.s32.totalorder %s266_s15, %s1785_s17  ;;  %p1794_p3 = scmp.lt.s32.totalorder %s1785_s17, %s1785_s17 }
  0x3c   : > { %p1788_p9 = pnand %p1786_p1, %p1698_p12  ;;  %p1795_p5 = por %p1794_p3, %p1793_p0 }
  0x3e   : > { %p1789_p13 = pneg %p1788_p9 }
  0x40   : > { %p1796_p10 = pnand %p1795_p5, %p1789_p13 }
  0x42   : > { %1799 = shalt.err (!%p1796_p10)
}
  0x43   : > { %1638 = dma.hbm_to_vmem [thread:$0]  (!%p2000_p11), %s2232_s6, 256, %s266_s15, [#allocation9], %s2235_s18, %s2235_s18, %s2236_s19  }
  0x44   : > { %s2051_s21 = sadd.s32 1, %s1900_s27   ;;  %s32_s12 = sadd.s32 1, %s1896_s26 }
  0x45   : > { %s29_s22 = ssub.s32 %s1900_s27, %s2051_s21  ;;  %p39_p12 = scmp.ne.s32.totalorder %s1896_s26, %s1892_s25 }
  0x46   : > { %p30_p7 = scmp.eq.s32.totalorder %s29_s22, 0  ;;  %p40_p1 = scmp.eq.s32.totalorder %s1900_s27, 0 }
  0x47   : > { %p2061_p9 = por %p195_p2, %p39_p12  ;;  %p1651_p13 = scmp.lt.s32.totalorder %s1900_s27, 2 }
  0x48   : > { %s2067_s29 = scalar_select %p30_p7, %s1896_s26, %s32_s12  }
  0x49   : > { %s2246_s23 = scalar_select %p2061_p9, 1, 0 }
  0x4a   : > { %p41_p0 = por %p40_p1, %p39_p12  ;;  %s279_s10 = sand.u32 1, %s1896_s26  }
  0x4b   : > { %s1351_s11 = sshll.u32 %s279_s10, 4  ;;  %s1387_s13 = sshll.u32 %s1900_s27, 8 }
  0x4c   : > { %s2074_s17 = scalar_lea.hbm %s2226_s0, %s1387_s13  ;;  %s283_s16 = scalar_lea.vmem [#allocation2], %s1351_s11 }
  0x4d   : > { %s290_s20 = sshll.u32 %s283_s16, 4  ;;  %p2078_p2 = pnand %p1651_p13, %p41_p0  ;;  %s2076_s20 = int_to_ptr.vmem [resolvable:$true] %s290_s20 }
  0x4e   : > { %s2082_s12 = scalar_lea.sflag [#allocation3], %s279_s10  ;;  %s1800_s18 = scalar_lea.hbm %s2074_s17, 256 }
  0x4f   : > { %p1801_p11 = scmp.ne.s32.totalorder %s2074_s17, %s1800_s18  ;;  %p1802_p3 = pneg %p2078_p2 }
  0x50   : > { %s1805_s11 = scalar_lea.hbm %s2226_s0, 512  ;;  %p1806_p12 = scmp.lt.s32.totalorder %s2074_s17, %s2226_s0 }
  0x51   : > { %p1803_p5 = pnand %p1802_p3, %p1801_p11  ;;  %p1807_p7 = scmp.lt.s32.totalorder %s1805_s11, %s1800_s18 }
  0x53   : > { %p1804_p10 = pneg %p1803_p5  ;;  %p1808_p1 = por %p1807_p7, %p1806_p12 }
  0x55   : > { %p1809_p13 = pnand %p1808_p1, %p1804_p10 }
  0x57   : > { %1812 = shalt.err (!%p1809_p13)
}
  0x58   : > { %s1813_s10 = scalar_lea.vmem %s2076_s20, 256  ;;  %s1908_s19 = smov [#allocation2]  }
  0x59   : > { %p1814_p0 = scmp.ne.s32.totalorder %s2076_s20, %s1813_s10  ;;  %s1818_s1 = sshll.u32 %s1908_s19, 4  ;;  %s1819_s1 = int_to_ptr.vmem [resolvable:$false] %s1818_s1 }
  0x5a   : > { %s1820_s13 = scalar_lea.vmem %s1819_s1, 512  ;;  %p1821_p5 = scmp.lt.s32.totalorder %s2076_s20, %s1819_s1 }
  0x5b   : > { %p1816_p6 = pnand %p1814_p0, %p1802_p3  ;;  %p1822_p9 = scmp.lt.s32.totalorder %s1820_s13, %s1813_s10 }
  0x5d   : > { %p1817_p11 = pneg %p1816_p6  ;;  %p1823_p4 = por %p1822_p9, %p1821_p5 }
  0x5f   : > { %p1824_p8 = pnand %p1823_p4, %p1817_p11 }
  0x61   : > { %1827 = shalt.err (!%p1824_p8)
}
  0x62   : > { %s2248_s18 = smov 8   ;;  %s2249_s14 = smov 128  }
  0x63   : > { %1642 = dma.hbm_to_vmem [thread:$0]  (!%p2078_p2), %s2074_s17, 256, %s2076_s20, %s2082_s12, %s2249_s14, %s2249_s14, %s2248_s18  }
  0x64   : > { %p2250_p6 = scmp.ne.s32.totalorder %s2243_s9, 0 }
  0x65   : > { %s2109_s19 = sand.u32 (!%p2250_p6), 1, %s1892_s25   ;;  %p2251_p4 = scmp.ne.s32.totalorder (!%p2250_p6), %s2241_s30, 0 }
  0x66   : > { %302 = sbr.rel (%p2250_p6) target bundleno = 1090 (0x442), region = 48  ;;  %s1355_s1 = sshll.u32 (!%p2250_p6), %s2109_s19, 4 }
  0x67   : > { %s305_s11 = scalar_lea.sflag (!%p2250_p6), [#allocation3], %s2109_s19  ;;  %s2113_s15 = scalar_lea.vmem (!%p2250_p6), [#allocation2], %s1355_s1 }
  0x6b   : > { %1871 = dma.done.wait (%p2251_p4), %s305_s11, 256  }
  0x6c   : > { %1873 = vsyncadd (%p2251_p4), %s305_s11, 4294967040  ;;  %p2252_p8 = scmp.eq.s32.totalorder %s1972_s28, 0 }
  0x6e   : > { %1875 = dma.done.wait (%p2252_p8), [#allocation6], 6144   ;;  %p2253_p9 = pmov %p2252_p8 }
  0x6f   : > { %p2254_p2 = pmov %p2252_p8 }
  0x70   : > { %1877 = vsyncadd (%p2253_p9), [#allocation6], 4294961152 }
  0x71   : > { %1879 = dma.done.wait (%p2254_p2), [#allocation9], 512   ;;  %p2255_p3 = pmov %p2254_p2 }
  0x72   : > { %v369_v0 = vld [vmem:[#allocation5 + $0x38] sm:$0xff]  ;;  %v368_v1 = vld [vmem:[#allocation5 + $0x30] sm:$0xff]  ;;  %vm370_vm0 = vcmask 523264   ;;  %v367_v2 = vld [vmem:[#allocation5 + $0x28] sm:$0xff]  ;;  %vm545_vm1 = vcmask 130048   ;;  %s1360_s22 = sshll.u32 %s2109_s19, 3 }
  0x73   : > { %1881 = vsyncadd (%p2255_p3), [#allocation9], 4294966784  ;;  %1464 = vmatprep.subr.mxu0 %v369_v0  ;;  %v469_v3 = vld [vmem:[#allocation5 + $0xb8] sm:$0xff]  ;;  %v2128_v4 = vld [vmem:[%s2113_s15] sm:$0xff]  ;;  %s1909_s12 = smov 64   ;;  %s354_s16 = scalar_lea.vmem [#allocation11], %s1360_s22 }
  0x74   : > { %1465 = vmatpush3.msra.mxu0 %v369_v0  ;;  %1483 = vmatprep.subr.mxu1 %v469_v3  ;;  %v468_v5 = vld [vmem:[#allocation5 + $0xb0] sm:$0xff]  ;;  %v366_v6 = vld [vmem:[#allocation5 + $0x20] sm:$0xff]  ;;  %v467_v7 = vld [vmem:[#allocation5 + $0xa8] sm:$0xff]  ;;  %s1384_s10 = sshll.u32 %s1972_s28, 7  ;;  %s1236_s13 = sshll.u32 %s354_s16, 4  ;;  %vm1220_vm2 = vcmask 1048064   ;;  %s1237_s13 = int_to_ptr.vmem [resolvable:$true] %s1236_s13 }
  0x75   : > { %1466 = vmatprep.subr.mxu0 %v368_v1  ;;  %1480 = vmatprep.mubr.msk.f32.mxu0 %vm370_vm0, %v2128_v4  ;;  %v365_v8 = vld [vmem:[#allocation5 + $0x18] sm:$0xff]  ;;  %v466_v9 = vld [vmem:[#allocation5 + $0xa0] sm:$0xff]  ;;  %v364_v10 = vld [vmem:[#allocation5 + $0x10] sm:$0xff]  ;;  %s2189_s1 = scalar_lea.hbm %s2233_s7, %s1384_s10  ;;  %s1223_s11 = scalar_lea.sflag [#allocation4], %s2109_s19 }
  0x76   : > { %1467 = vmatpush3.msra.mxu0 %v368_v1  ;;  %1484 = vmatpush3.msra.mxu1 %v469_v3  ;;  %v465_v11 = vld [vmem:[#allocation5 + $0x98] sm:$0xff]  ;;  %v363_v12 = vld [vmem:[#allocation5 + $0x8] sm:$0xff]  ;;  %v464_v13 = vld [vmem:[#allocation5 + $0x90] sm:$0xff]  ;;  %p2256_p12 = scmp.ne.s32.totalorder %s2246_s23, 0  ;;  %s1910_s30 = smov [#allocation11]  }
  0x77   : > { %1468 = vmatprep.subr.mxu0 %v367_v2  ;;  %1485 = vmatprep.subr.mxu1 %v468_v5  ;;  %v362_v14 = vld [vmem:[#allocation5] sm:$0xff]  ;;  %v463_v15 = vld [vmem:[#allocation5 + $0x88] sm:$0xff]  ;;  %v2145_v19 = vld [vmem:[#allocation10] sm:$0xff]  ;;  %s1832_s9 = sshll.u32 %s1910_s30, 4  ;;  %s1833_s9 = int_to_ptr.vmem [resolvable:$false] %s1832_s9 }
  0x78   : > { %1469 = vmatpush3.msra.mxu0 %v367_v2  ;;  %1486 = vmatpush3.msra.mxu1 %v468_v5  ;;  %v2133_v16 = vld [vmem:[%s2113_s15 + $0x8] sm:$0xff]  ;;  %v462_v17 = vld [vmem:[#allocation5 + $0x80] sm:$0xff]  ;;  %v459_v25 = vld [vmem:[#allocation5 + $0x70] sm:$0xff]  ;;  %s1828_s15 = scalar_lea.vmem %s1237_s13, 128  ;;  %s1834_s28 = scalar_lea.vmem %s1833_s9, 256 }
  0x79   : > { %1470 = vmatprep.subr.mxu0 %v366_v6  ;;  %1487 = vmatprep.subr.mxu1 %v467_v7  ;;  %v2141_v18 = vld [vmem:[#allocation8] sm:$0xff]  ;;  %v2149_v22 = vld [vmem:[#allocation8 + $0x8] sm:$0xff]  ;;  %v460_v23 = vld [vmem:[#allocation5 + $0x78] sm:$0xff]  ;;  %p1829_p10 = scmp.ne.s32.totalorder %s1237_s13, %s1828_s15  ;;  %p1835_p13 = scmp.lt.s32.totalorder %s1237_s13, %s1833_s9 }
  0x7a   : > { %1471 = vmatpush3.msra.mxu0 %v366_v6  ;;  %1488 = vmatpush3.msra.mxu1 %v467_v7  ;;  %v458_v27 = vld [vmem:[#allocation5 + $0x68] sm:$0xff]  ;;  %v2153_v28 = vld [vmem:[#allocation10 + $0x8] sm:$0xff]  ;;  %v457_v29 = vld [vmem:[#allocation5 + $0x60] sm:$0xff]  ;;  %p1836_p0 = scmp.lt.s32.totalorder %s1834_s28, %s1828_s15 }
  0x7b   : > { %1472 = vmatprep.subr.mxu0 %v365_v8  ;;  %1489 = vmatprep.subr.mxu1 %v466_v9  ;;  %v456_v30 = vld [vmem:[#allocation5 + $0x58] sm:$0xff]  ;;  %v455_v31 = vld [vmem:[#allocation5 + $0x50] sm:$0xff]  ;;  %v454_v32 = vld [vmem:[#allocation5 + $0x48] sm:$0xff]  ;;  %p1830_p7 = pnand %p1829_p10, %p2256_p12 }
  0x7c   : > { %1473 = vmatpush3.msra.mxu0 %v365_v8  ;;  %1490 = vmatpush3.msra.mxu1 %v466_v9  ;;  %v453_v33 = vld [vmem:[#allocation5 + $0x40] sm:$0xff]  ;;  %v803_v34 = vld [vmem:[#allocation7 + $0x38] sm:$0xff]  ;;  %v802_v36 = vld [vmem:[#allocation7 + $0x30] sm:$0xff]  ;;  %p1837_p11 = por %p1836_p0, %p1835_p13 }
  0x7d   : > { %1474 = vmatprep.subr.mxu0 %v364_v10  ;;  %1491 = vmatprep.subr.mxu1 %v465_v11  ;;  %v902_v35 = vld [vmem:[#allocation7 + $0xb8] sm:$0xff]  ;;  %v901_v37 = vld [vmem:[#allocation7 + $0xb0] sm:$0xff]  ;;  %v801_v38 = vld [vmem:[#allocation7 + $0x28] sm:$0xff]  ;;  %p1831_p1 = pneg %p1830_p7 }
  0x7e   : > { %1475 = vmatpush3.msra.mxu0 %v364_v10  ;;  %1492 = vmatpush3.msra.mxu1 %v465_v11  ;;  %v900_v39 = vld [vmem:[#allocation7 + $0xa8] sm:$0xff]  ;;  %v800_v40 = vld [vmem:[#allocation7 + $0x20] sm:$0xff]  ;;  %v799_v42 = vld [vmem:[#allocation7 + $0x18] sm:$0xff] }
  0x7f   : > { %1476 = vmatprep.subr.mxu0 %v363_v12  ;;  %1493 = vmatprep.subr.mxu1 %v464_v13  ;;  %v899_v41 = vld [vmem:[#allocation7 + $0xa0] sm:$0xff]  ;;  %v898_v43 = vld [vmem:[#allocation7 + $0x98] sm:$0xff]  ;;  %v798_v44 = vld [vmem:[#allocation7 + $0x10] sm:$0xff]  ;;  %p1838_p5 = pnand %p1837_p11, %p1831_p1 }
  0x80   : > { %1477 = vmatpush3.msra.mxu0 %v363_v12  ;;  %1494 = vmatpush3.msra.mxu1 %v464_v13  ;;  %v897_v45 = vld [vmem:[#allocation7 + $0x90] sm:$0xff]  ;;  %v797_v46 = vld [vmem:[#allocation7 + $0x8] sm:$0xff]  ;;  %v796_v48 = vld [vmem:[#allocation7] sm:$0xff] }
  0x81   : > { %1478 = vmatprep.subr.mxu0 %v362_v14  ;;  %1495 = vmatprep.subr.mxu1 %v463_v15  ;;  %v896_v47 = vld [vmem:[#allocation7 + $0x88] sm:$0xff]  ;;  %v895_v49 = vld [vmem:[#allocation7 + $0x80] sm:$0xff]  ;;  %v893_v6 = vld [vmem:[#allocation7 + $0x78] sm:$0xff] }
  0x82   : > { %1479 = vmatpush3.msra.mxu0 %v362_v14  ;;  %1496 = vmatpush3.msra.mxu1 %v463_v15  ;;  %v1371_v56 = vld [vmem:[%s2228_s2] ss:$0 sm:$0xff]  ;;  %v892_v7 = vld [vmem:[#allocation7 + $0x70] sm:$0xff]  ;;  %v891_v8 = vld [vmem:[#allocation7 + $0x68] sm:$0xff] }
  0x83   : > { %1481 = vmatmul.mubr.msk.f32.vlgmr.msra.gmra.mxu0 %vm370_vm0, %v2133_v16  ;;  %1497 = vmatprep.subr.mxu1 %v462_v17  ;;  %v890_v9 = vld [vmem:[#allocation7 + $0x60] sm:$0xff]  ;;  %v889_v10 = vld [vmem:[#allocation7 + $0x58] sm:$0xff]  ;;  %v888_v11 = vld [vmem:[#allocation7 + $0x50] sm:$0xff] }
  0x84   : > { %1499 = vmatprep.mubr.msk.f32.mxu1 %vm370_vm0, %v2128_v4  ;;  %1498 = vmatpush3.msra.mxu1 %v462_v17  ;;  %v887_v12 = vld [vmem:[#allocation7 + $0x48] sm:$0xff]  ;;  %v886_v13 = vld [vmem:[#allocation7 + $0x40] sm:$0xff] }
  0x85   : > { %1500 = vmatmul.mubr.msk.f32.vlgmr.msra.gmra.mxu1 %vm370_vm0, %v2133_v16  ;;  %1532 = vmatprep.mubr.msk.f32.mxu0 %vm545_vm1, %v2145_v19 }
  0x86   : > { %1506 = vmatprep.mubr.msk.f32.mxu1 %vm545_vm1, %v2141_v18 }
 0x143   : > { %v1482_v20 = vpop.f32.mrf.mxu0 }
 0x144   : > { %1502 = vmatprep.subr.mxu1 %v1482_v20 }
 0x145   : > { %v443_v21 = vpop.f32.mrf.mxu0  ;;  %1503 = vmatpush3.msra.mxu1 %v1482_v20  ;;  %v1501_v24 = vpop.f32.mrf.mxu1  ;;  %v1382_v20 = vld [vmem:[%s2230_s4] ss:$0 sm:$0xff] }
 0x146   : > { %1504 = vmatprep.subr.mxu1 %v443_v21  ;;  %1528 = vmatprep.subr.mxu0 %v1501_v24 }
 0x147   : > { %1505 = vmatpush3.msra.mxu1 %v443_v21  ;;  %v536_v26 = vpop.f32.mrf.mxu1  ;;  %1529 = vmatpush3.msra.mxu0 %v1501_v24 }
 0x148   : > { %1507 = vmatmul.mubr.msk.f32.vlgmr.msra.gmra.mxu1 %vm545_vm1, %v2149_v22  ;;  %1509 = vmatprep.subr.mxu1 %v460_v23 }
 0x149   : > { %1510 = vmatpush3.msra.mxu1 %v460_v23  ;;  %1530 = vmatprep.subr.mxu0 %v536_v26 }
 0x14a   : > { %1511 = vmatprep.subr.mxu1 %v459_v25  ;;  %1531 = vmatpush3.msra.mxu0 %v536_v26 }
 0x14b   : > { %1512 = vmatpush3.msra.mxu1 %v459_v25  ;;  %1525 = vmatprep.mubr.msk.f32.mxu1 %vm370_vm0, %v2128_v4 }
 0x14c   : > { %1513 = vmatprep.subr.mxu1 %v458_v27  ;;  %1533 = vmatmul.mubr.msk.f32.vlgmr.msra.gmra.mxu0 %vm545_vm1, %v2153_v28 }
 0x14d   : > { %1514 = vmatpush3.msra.mxu1 %v458_v27  ;;  %1535 = vmatprep.subr.mxu0 %v803_v34 }
 0x14e   : > { %1515 = vmatprep.subr.mxu1 %v457_v29  ;;  %1536 = vmatpush3.msra.mxu0 %v803_v34 }
 0x14f   : > { %1516 = vmatpush3.msra.mxu1 %v457_v29  ;;  %1537 = vmatprep.subr.mxu0 %v802_v36 }
 0x150   : > { %1517 = vmatprep.subr.mxu1 %v456_v30  ;;  %1538 = vmatpush3.msra.mxu0 %v802_v36 }
 0x151   : > { %1518 = vmatpush3.msra.mxu1 %v456_v30  ;;  %1539 = vmatprep.subr.mxu0 %v801_v38 }
 0x152   : > { %1519 = vmatprep.subr.mxu1 %v455_v31  ;;  %1540 = vmatpush3.msra.mxu0 %v801_v38 }
 0x153   : > { %1520 = vmatpush3.msra.mxu1 %v455_v31  ;;  %1541 = vmatprep.subr.mxu0 %v800_v40 }
 0x154   : > { %1521 = vmatprep.subr.mxu1 %v454_v32  ;;  %1542 = vmatpush3.msra.mxu0 %v800_v40 }
 0x155   : > { %1522 = vmatpush3.msra.mxu1 %v454_v32  ;;  %1543 = vmatprep.subr.mxu0 %v799_v42 }
 0x156   : > { %1523 = vmatprep.subr.mxu1 %v453_v33  ;;  %1544 = vmatpush3.msra.mxu0 %v799_v42 }
 0x157   : > { %1524 = vmatpush3.msra.mxu1 %v453_v33  ;;  %1545 = vmatprep.subr.mxu0 %v798_v44 }
 0x158   : > { %1526 = vmatmul.mubr.msk.f32.vlgmr.msra.gmra.mxu1 %vm370_vm0, %v2133_v16  ;;  %1554 = vmatprep.subr.mxu1 %v902_v35 }
 0x159   : > { %1555 = vmatpush3.msra.mxu1 %v902_v35  ;;  %1546 = vmatpush3.msra.mxu0 %v798_v44 }
 0x15a   : > { %1556 = vmatprep.subr.mxu1 %v901_v37  ;;  %1547 = vmatprep.subr.mxu0 %v797_v46 }
 0x15b   : > { %1557 = vmatpush3.msra.mxu1 %v901_v37  ;;  %1548 = vmatpush3.msra.mxu0 %v797_v46 }
 0x15c   : > { %1558 = vmatprep.subr.mxu1 %v900_v39  ;;  %1549 = vmatprep.subr.mxu0 %v796_v48 }
 0x15d   : > { %1559 = vmatpush3.msra.mxu1 %v900_v39  ;;  %1550 = vmatpush3.msra.mxu0 %v796_v48 }
 0x15e   : > { %1560 = vmatprep.subr.mxu1 %v899_v41 }
 0x15f   : > { %1561 = vmatpush3.msra.mxu1 %v899_v41 }
 0x160   : > { %1562 = vmatprep.subr.mxu1 %v898_v43 }
 0x161   : > { %1563 = vmatpush3.msra.mxu1 %v898_v43 }
 0x162   : > { %1564 = vmatprep.subr.mxu1 %v897_v45 }
 0x163   : > { %1565 = vmatpush3.msra.mxu1 %v897_v45 }
 0x164   : > { %1566 = vmatprep.subr.mxu1 %v896_v47 }
 0x165   : > { %1567 = vmatpush3.msra.mxu1 %v896_v47 }
 0x166   : > { %1568 = vmatprep.subr.mxu1 %v895_v49 }
 0x167   : > { %1569 = vmatpush3.msra.mxu1 %v895_v49 }
 0x208   : > { %v1508_v50 = vpop.f32.mrf.mxu1 }
 0x20a   : > { %v618_v51 = vpop.f32.mrf.mxu1 }
 0x20c   : > { %v1534_v53 = vpop.f32.mrf.mxu0 }
 0x20e   : > { %v774_v59 = vpop.f32.mrf.mxu0 }
 0x218   : > { %v1527_v52 = vpop.f32.mrf.mxu1 }
 0x219   : > { %v699_v54 = vadd.f32 %v1527_v52, %v1508_v50 }
 0x21a   : > { %v693_v55 = vpop.f32.mrf.mxu1 }
 0x21b   : > { %v784_v57 = vadd.f32 %v1534_v53, %v699_v54  ;;  %v694_v58 = vadd.f32 %v693_v55, %v618_v51 }
 0x21d   : > { %v783_v60 = vadd.f32 %v774_v59, %v694_v58  ;;  %v792_v61 = vadd.f32 %v1371_v56, %v784_v57 }
 0x21f   : > { %v791_v62 = vadd.f32 %v1371_v56, %v783_v60  ;;  %v794_v0 = vmax.f32 %v792_v61, 0.0 }
 0x221   : > { %v793_v63 = vmax.f32 %v791_v62, 0.0 }
 0x223   : > { %1551 = vmatprep.mubr.msk.f32.mxu0 %vm370_vm0, %v793_v63  ;;  %1570 = vmatprep.mubr.msk.f32.mxu1 %vm370_vm0, %v793_v63 }
 0x224   : > { %1552 = vmatmul.mubr.msk.f32.vlgmr.msra.gmra.mxu0 %vm370_vm0, %v794_v0  ;;  %1571 = vmatmul.mubr.msk.f32.vlgmr.msra.gmra.mxu1 %vm370_vm0, %v794_v0 }
 0x225   : > { %1577 = vmatprep.mubr.msk.f32.mxu0 %vm545_vm1, %v2141_v18  ;;  %1603 = vmatprep.mubr.msk.f32.mxu1 %vm545_vm1, %v2145_v19 }
 0x2e4   : > { %v1553_v1 = vpop.f32.mrf.mxu0  ;;  %v1572_v2 = vpop.f32.mrf.mxu1 }
 0x2e5   : > { %1573 = vmatprep.subr.mxu0 %v1553_v1  ;;  %1599 = vmatprep.subr.mxu1 %v1572_v2 }
 0x2e6   : > { %v876_v3 = vpop.f32.mrf.mxu0  ;;  %v969_v5 = vpop.f32.mrf.mxu1  ;;  %1574 = vmatpush3.msra.mxu0 %v1553_v1  ;;  %1600 = vmatpush3.msra.mxu1 %v1572_v2 }
 0x2e7   : > { %1575 = vmatprep.subr.mxu0 %v876_v3  ;;  %1601 = vmatprep.subr.mxu1 %v969_v5 }
 0x2e8   : > { %1576 = vmatpush3.msra.mxu0 %v876_v3  ;;  %1602 = vmatpush3.msra.mxu1 %v969_v5 }
 0x2e9   : > { %1578 = vmatmul.mubr.msk.f32.vlgmr.msra.gmra.mxu0 %vm545_vm1, %v2149_v22  ;;  %1580 = vmatprep.subr.mxu0 %v893_v6 }
 0x2ea   : > { %1581 = vmatpush3.msra.mxu0 %v893_v6  ;;  %1596 = vmatprep.mubr.msk.f32.mxu0 %vm370_vm0, %v793_v63 }
 0x2eb   : > { %1582 = vmatprep.subr.mxu0 %v892_v7  ;;  %1604 = vmatmul.mubr.msk.f32.vlgmr.msra.gmra.mxu1 %vm545_vm1, %v2153_v28 }
 0x2ec   : > { %1583 = vmatpush3.msra.mxu0 %v892_v7 }
 0x2ed   : > { %1584 = vmatprep.subr.mxu0 %v891_v8 }
 0x2ee   : > { %1585 = vmatpush3.msra.mxu0 %v891_v8 }
 0x2ef   : > { %1586 = vmatprep.subr.mxu0 %v890_v9 }
 0x2f0   : > { %1587 = vmatpush3.msra.mxu0 %v890_v9 }
 0x2f1   : > { %1588 = vmatprep.subr.mxu0 %v889_v10 }
 0x2f2   : > { %1589 = vmatpush3.msra.mxu0 %v889_v10 }
 0x2f3   : > { %1590 = vmatprep.subr.mxu0 %v888_v11 }
 0x2f4   : > { %1591 = vmatpush3.msra.mxu0 %v888_v11 }
 0x2f5   : > { %1592 = vmatprep.subr.mxu0 %v887_v12 }
 0x2f6   : > { %1593 = vmatpush3.msra.mxu0 %v887_v12 }
 0x2f7   : > { %1594 = vmatprep.subr.mxu0 %v886_v13 }
 0x2f8   : > { %1595 = vmatpush3.msra.mxu0 %v886_v13 }
 0x2f9   : > { %1597 = vmatmul.mubr.msk.f32.vlgmr.msra.gmra.mxu0 %vm370_vm0, %v794_v0 }
 0x3a9   : > { %v1579_v14 = vpop.f32.mrf.mxu0 }
 0x3ab   : > { %v1044_v15 = vpop.f32.mrf.mxu0  ;;  %v1605_v18 = vpop.f32.mrf.mxu1 }
 0x3ad   : > { %v1194_v24 = vpop.f32.mrf.mxu1 }
 0x3b9   : > { %v1598_v17 = vpop.f32.mrf.mxu0 }
 0x3ba   : > { %v1125_v19 = vadd.f32 %v1598_v17, %v1579_v14 }
 0x3bb   : > { %v1119_v21 = vpop.f32.mrf.mxu0 }
 0x3bc   : > { %v1204_v22 = vadd.f32 %v1605_v18, %v1125_v19  ;;  %v1120_v23 = vadd.f32 %v1119_v21, %v1044_v15 }
 0x3be   : > { %v1212_v25 = vadd.f32 %v1382_v20, %v1204_v22  ;;  %v1203_v26 = vadd.f32 %v1194_v24, %v1120_v23 }
 0x3c0   : > { %v1211_v27 = vadd.f32 %v1382_v20, %v1203_v26  ;;  %v1214_v28 = vadd.f32 %v1212_v25, %v2133_v16 }
 0x3c2   : > { %v1213_v29 = vadd.f32 %v1211_v27, %v2128_v4  ;;  %1217 = vrot.lane.b32.xlu0 %v1214_v28, %s1909_s12 }
 0x3c4   : > { %1215 = vst.msk [vmem:[%s354_s16] sm:$0xff] %vm370_vm0, %v1213_v29 }
 0x434   : > { %v1218_v30 = vpop.permute.xlu0 %1217 }
 0x435   : > { %1221 = vst.msk [vmem:[%s354_s16] sm:$0xff] %vm1220_vm2, %v1218_v30 }
 0x436   : > { %1841 = shalt.err (!%p1838_p5)
}
 0x437   : > { %s1842_s17 = scalar_lea.hbm %s2189_s1, 128  ;;  %s1846_s22 = scalar_lea.hbm %s2233_s7, 256 }
 0x438   : > { %p1843_p6 = scmp.ne.s32.totalorder %s2189_s1, %s1842_s17  ;;  %p1847_p9 = scmp.lt.s32.totalorder %s2189_s1, %s2233_s7 }
 0x439   : > { %p1848_p2 = scmp.lt.s32.totalorder %s1846_s22, %s1842_s17 }
 0x43a   : > { %p1844_p4 = pnand %p1843_p6, %p2256_p12 }
 0x43b   : > { %p1849_p3 = por %p1848_p2, %p1847_p9 }
 0x43c   : > { %p1845_p8 = pneg %p1844_p4 }
 0x43e   : > { %p1850_p10 = pnand %p1849_p3, %p1845_p8 }
 0x440   : > { %1853 = shalt.err (!%p1850_p10)
}
 0x441   : > { %1624 = dma.vmem_to_hbm [thread:$0]  (%p2256_p12), %s1237_s13, 128, %s2189_s1, %s1223_s11  }
 0x442 PF: > { %s1248_s10 = sand.u32 1, %s1888_s24   ;;  %p2257_p7 = scmp.ne.s32.totalorder %s2242_s8, 0 }
 0x443   : > { %p2258_p1 = scmp.ge.s32.totalorder %s1900_s27, 2  ;;  %s1249_s18 = scalar_lea.sflag [#allocation4], %s1248_s10 }
 0x445   : > { %p1644_p13 = pnand %p2258_p1, %p2257_p7 }
 0x447   : > { %p1645_p0 = pneg %p1644_p13 }
 0x449   : > { %1883 = dma.done.wait (%p1645_p0), %s1249_s18, 128  }
 0x44a   : > { %1885 = vsyncadd (%p1645_p0), %s1249_s18, 4294967168  ;;  %p22_p11 = scmp.ge.s32.totalorder %s2051_s21, 4   ;;  %s2259_s24 = smov %s1892_s25 }
 0x44b   : > { %s2260_s25 = smov %s1896_s26  ;;  %s2261_s26 = smov %s2067_s29 }
 0x44c   : > { %s2262_s27 = smov %s2051_s21  ;;  %24 = sbr.rel (!%p22_p11) target bundleno = 9 (0x9), region = 113 }
 0x451   :  { %1254 = vsyncpa [#allocation3], 1 }
 0x452   :  { %1256 = vsyncpa [#allocation3 + $0x1], 1 }
 0x453   :  { %1257 = vsyncpa [#allocation6], 1 }
 0x454   :  { %1258 = vsyncpa [#allocation9], 1 }
 0x455   :  { %1259 = vsyncpa [#allocation4], 1 }
 0x456   :  { %1261 = vsyncpa [#allocation4 + $0x1], 1 }

</bundles_post_ra>
